<compile_context>
chip_gen: v6e
topology: v6e:2x2x1
jax: 0.10.0
libtpu: 0.0.40
codegen_flags: <defaults>
</compile_context>

<pallas_src>
import functools

import jax
import jax.numpy as jnp
from jax.experimental import pallas as pl
from jax.experimental.pallas import tpu as pltpu

LANE = 128               # TPU lane width (last dim of every vreg tile)
SUB = 8                  # sublanes per f32 vreg
DEFAULT_ROW_TILE = 2048  # rows per grid step: 2048*128*4B = 1 MiB per input block
NCORES_MAX = 2           # v7x has 2 TensorCores; harmless on 1-TC chips


def _focal_tversky_kernel(pred_ref, targ_ref, part_ref,
                          acc_pt, acc_p, acc_t,
                          *, rows, row_tile, steps, needs_mask):
    """Accumulate per-lane partial sums of p*t, p, t.

    Grid = (ncores, steps): axis 0 is 'parallel' (core split on v7x), axis 1
    is the sequential reduction over the row tiles owned by that core.

    acc_*    : VMEM (8, 128) f32 full-vreg accumulators (pure elementwise adds
               in the hot loop; cross-sublane reduction deferred to finalize).
    part_ref : (1, 3, 128) per-core output block, rows = [sum(p*t), sum(p), sum(t)]
               reduced over sublanes but still per-lane.
    """
    k = pl.program_id(1)

    @pl.when(k == 0)
    def _init():
        acc_pt[...] = jnp.zeros_like(acc_pt)
        acc_p[...] = jnp.zeros_like(acc_p)
        acc_t[...] = jnp.zeros_like(acc_t)

    p = pred_ref[...].astype(jnp.float32)   # (row_tile, LANE)
    t = targ_ref[...].astype(jnp.float32)   # (row_tile, LANE)

    # Reduce each (row_tile, 128) tile to one (8, 128) vreg with pure VALU adds
    # (the reshape splits exactly on (8, 128) tile boundaries -> no copy).
    g = row_tile // SUB

    def _accum(pv, tv):
        acc_pt[...] += jnp.sum((pv * tv).reshape(g, SUB, LANE), axis=0)
        acc_p[...] += jnp.sum(pv.reshape(g, SUB, LANE), axis=0)
        acc_t[...] += jnp.sum(tv.reshape(g, SUB, LANE), axis=0)

    if needs_mask:
        # Logical (unclamped) block position; rows at/after `rows` contribute 0.
        c = pl.program_id(0)
        row0 = (c * steps + k) * row_tile

        @pl.when(row0 + row_tile <= rows)
        def _full_block():           # fast path: no mask work at all
            _accum(p, t)

        @pl.when(row0 + row_tile > rows)
        def _partial_block():        # ragged tail / duplicated clamped visit
            local = jax.lax.broadcasted_iota(jnp.int32, (row_tile, LANE), 0)
            valid = (row0 + local) < rows
            _accum(jnp.where(valid, p, 0.0), jnp.where(valid, t, 0.0))
    else:
        _accum(p, t)

    @pl.when(k == pl.num_programs(1) - 1)
    def _finalize():
        part_ref[0, 0:1, :] = jnp.sum(acc_pt[...], axis=0, keepdims=True)
        part_ref[0, 1:2, :] = jnp.sum(acc_p[...], axis=0, keepdims=True)
        part_ref[0, 2:3, :] = jnp.sum(acc_t[...], axis=0, keepdims=True)


def focal_tversky_loss(pred, target, alpha=0.5, beta=0.5, gamma=1.0,
                       smooth=1e-6, row_tile=DEFAULT_ROW_TILE):
    """Matches FocalTverskyLoss.forward(pred, target); returns a scalar f32."""
    p = pred.reshape(-1)
    t = target.reshape(-1)
    n = p.shape[0]

    # Only element counts that are not a multiple of 8*128 pay a host-side pad
    # (zero padding contributes 0 to TP / sum(p) / sum(t)).
    chunk = SUB * LANE
    if n % chunk != 0:
        pad = chunk - n % chunk
        p = jnp.pad(p, (0, pad))
        t = jnp.pad(t, (0, pad))

    rows = p.shape[0] // LANE            # always a multiple of SUB
    p2 = p.reshape(rows, LANE)           # free reshape of contiguous data
    t2 = t.reshape(rows, LANE)

    row_tile = min(row_tile, rows)       # both multiples of SUB
    nblocks = pl.cdiv(rows, row_tile)
    ncores = min(NCORES_MAX, nblocks)    # leading 'parallel' axis (2 TCs on v7x)
    steps = pl.cdiv(nblocks, ncores)
    # Mask iff the ncores*steps row-tile visits over-cover `rows` (ragged tail
    # or odd block count split across 2 cores).
    needs_mask = (ncores * steps * row_tile) != rows

    def in_map(c, k):
        blk = c * steps + k
        if ncores * steps != nblocks:    # static check
            # Keep the DMA in bounds; the over-covering visit is fully masked
            # out in the kernel (the mask uses the logical, unclamped block).
            blk = jnp.minimum(blk, nblocks - 1)
        return (blk, 0)

    kernel = functools.partial(
        _focal_tversky_kernel,
        rows=rows, row_tile=row_tile, steps=steps, needs_mask=needs_mask)

    partials = pl.pallas_call(
        kernel,
        out_shape=jax.ShapeDtypeStruct((ncores, 3, LANE), jnp.float32),
        grid_spec=pltpu.PrefetchScalarGridSpec(
            num_scalar_prefetch=0,
            grid=(ncores, steps),
            in_specs=[
                pl.BlockSpec((row_tile, LANE), in_map),
                pl.BlockSpec((row_tile, LANE), in_map),
            ],
            out_specs=pl.BlockSpec((1, 3, LANE), lambda c, k: (c, 0, 0)),
            scratch_shapes=[pltpu.VMEM((SUB, LANE), jnp.float32)] * 3,
        ),
        compiler_params=pltpu.CompilerParams(
            dimension_semantics=("parallel", "arbitrary"),
            vmem_limit_bytes=32 * 1024 * 1024,
        ),
    )(p2, t2)

    # Tiny scalar epilogue in the wrapper (cross-core + cross-lane combine).
    sums = jnp.sum(partials, axis=(0, 2))        # (3,): [TP, sum(p), sum(t)]
    tp, sum_p, sum_t = sums[0], sums[1], sums[2]
    fp = sum_p - tp
    fn = sum_t - tp
    tversky = (tp + smooth) / (tp + alpha * fp + beta * fn + smooth)
    # smooth > 0 keeps tversky > 0, so jnp power matches torch.pow here.
    return (1.0 - tversky ** gamma).astype(jnp.float32)


def _reference(pred, target, alpha=0.5, beta=0.5, gamma=1.0, smooth=1e-6):
    pf = pred.reshape(-1).astype(jnp.float32)
    tf = target.reshape(-1).astype(jnp.float32)
    tp = jnp.sum(pf * tf)
    fp = jnp.sum((1.0 - tf) * pf)
    fn = jnp.sum(tf * (1.0 - pf))
    tversky = (tp + smooth) / (tp + alpha * fp + beta * fn + smooth)
    return 1.0 - tversky ** gamma


if __name__ == "__main__":
    key = jax.random.PRNGKey(0)
    k1, k2, k3, k4, k5, k6 = jax.random.split(key, 6)

    # Primary check: NCHW (B=2, C=4, H=16, W=16), as in the PyTorch module.
    pred = jax.nn.sigmoid(jax.random.normal(k1, (2, 4, 16, 16), jnp.float32))
    target = (jax.random.uniform(k2, (2, 4, 16, 16)) > 0.5).astype(jnp.float32)

    loss = jax.block_until_ready(focal_tversky_loss(pred, target))
    ref = _reference(pred, target)
    assert jnp.allclose(loss, ref, rtol=1e-4, atol=1e-6), (loss, ref)

    # Secondary check: exercises the multi-block / 2-way core split / clamped
    # duplicate-visit mask path by forcing a deliberately tiny row tile.
    pred2 = jax.nn.sigmoid(jax.random.normal(k3, (2, 4, 16, 24), jnp.float32))
    target2 = (jax.random.uniform(k4, (2, 4, 16, 24)) > 0.5).astype(jnp.float32)
    loss2 = jax.block_until_ready(focal_tversky_loss(pred2, target2, row_tile=8))
    ref2 = _reference(pred2, target2)
    assert jnp.allclose(loss2, ref2, rtol=1e-4, atol=1e-6), (loss2, ref2)

    # Third check: element count not a multiple of 8*128 -> host-side pad path.
    pred3 = jax.nn.sigmoid(jax.random.normal(k5, (3, 5, 7, 11), jnp.float32))
    target3 = (jax.random.uniform(k6, (3, 5, 7, 11)) > 0.5).astype(jnp.float32)
    loss3 = jax.block_until_ready(focal_tversky_loss(pred3, target3))
    ref3 = _reference(pred3, target3)
    assert jnp.allclose(loss3, ref3, rtol=1e-4, atol=1e-6), (loss3, ref3)

    print("KERNEL_OK")
</pallas_src>

<mosaic_0001>
module attributes {stable_mosaic.version = 11 : i64} {
  func.func @_focal_tversky_kernel(%arg0: i32, %arg1: i32, %arg2: memref<16x128xf32, #tpu.memory_space<vmem>>, %arg3: memref<16x128xf32, #tpu.memory_space<vmem>>, %arg4: memref<1x3x128xf32, #tpu.memory_space<vmem>>, %arg5: memref<8x128xf32, #tpu.memory_space<vmem>>, %arg6: memref<8x128xf32, #tpu.memory_space<vmem>>, %arg7: memref<8x128xf32, #tpu.memory_space<vmem>>) attributes {dimension_semantics = [#tpu.dimension_semantics<parallel>, #tpu.dimension_semantics<arbitrary>], iteration_bounds = array<i64: 1, 1>, scalar_prefetch = 0 : i64, scratch_operands = 3 : i64, tpu.core_type = #tpu.core_type<tc>, window_params = [{transform_indices = @transform_0, window_bounds = array<i64: 16, 128>}, {transform_indices = @transform_1, window_bounds = array<i64: 16, 128>}, {transform_indices = @transform_2, window_bounds = array<i64: 1, 3, 128>}]} {
    %c0_i32 = arith.constant 0 : i32
    %0 = arith.cmpi eq, %arg1, %c0_i32 : i32
    %1 = arith.extui %0 : i1 to i32
    %c0_i32_0 = arith.constant 0 : i32
    %2 = arith.cmpi ne, %1, %c0_i32_0 : i32
    scf.if %2 {
      %cst_20 = arith.constant 0.000000e+00 : f32
      %24 = vector.broadcast %cst_20 : f32 to vector<8x128xf32>
      %c0_21 = arith.constant 0 : index
      %c0_22 = arith.constant 0 : index
      %25 = vector.load %arg5[%c0_21, %c0_22] : memref<8x128xf32, #tpu.memory_space<vmem>>, vector<8x128xf32>
      tpu.vector_store %arg5[%c0_21, %c0_22], %24 {strides = array<i32>} : memref<8x128xf32, #tpu.memory_space<vmem>>, vector<8x128xf32>,
      %cst_23 = arith.constant 0.000000e+00 : f32
      %26 = vector.broadcast %cst_23 : f32 to vector<8x128xf32>
      %c0_24 = arith.constant 0 : index
      %c0_25 = arith.constant 0 : index
      %27 = vector.load %arg6[%c0_24, %c0_25] : memref<8x128xf32, #tpu.memory_space<vmem>>, vector<8x128xf32>
      tpu.vector_store %arg6[%c0_24, %c0_25], %26 {strides = array<i32>} : memref<8x128xf32, #tpu.memory_space<vmem>>, vector<8x128xf32>,
      %cst_26 = arith.constant 0.000000e+00 : f32
      %28 = vector.broadcast %cst_26 : f32 to vector<8x128xf32>
      %c0_27 = arith.constant 0 : index
      %c0_28 = arith.constant 0 : index
      %29 = vector.load %arg7[%c0_27, %c0_28] : memref<8x128xf32, #tpu.memory_space<vmem>>, vector<8x128xf32>
      tpu.vector_store %arg7[%c0_27, %c0_28], %28 {strides = array<i32>} : memref<8x128xf32, #tpu.memory_space<vmem>>, vector<8x128xf32>,
    } else {
    }
    %c0 = arith.constant 0 : index
    %c0_1 = arith.constant 0 : index
    %3 = vector.load %arg2[%c0, %c0_1] : memref<16x128xf32, #tpu.memory_space<vmem>>, vector<16x128xf32>
    %c0_2 = arith.constant 0 : index
    %c0_3 = arith.constant 0 : index
    %4 = vector.load %arg3[%c0_2, %c0_3] : memref<16x128xf32, #tpu.memory_space<vmem>>, vector<16x128xf32>
    %c0_4 = arith.constant 0 : index
    %c0_5 = arith.constant 0 : index
    %5 = vector.load %arg5[%c0_4, %c0_5] : memref<8x128xf32, #tpu.memory_space<vmem>>, vector<8x128xf32>
    %6 = arith.mulf %3, %4 : vector<16x128xf32>
    %7 = vector.shape_cast %6 : vector<16x128xf32> to vector<2x8x128xf32>
    %cst = arith.constant dense<0.000000e+00> : vector<8x128xf32>
    %8 = vector.multi_reduction <add>, %7, %cst [0] : vector<2x8x128xf32> to vector<8x128xf32>
    %9 = arith.addf %5, %8 : vector<8x128xf32>
    %c0_6 = arith.constant 0 : index
    %c0_7 = arith.constant 0 : index
    %10 = vector.load %arg5[%c0_6, %c0_7] : memref<8x128xf32, #tpu.memory_space<vmem>>, vector<8x128xf32>
    tpu.vector_store %arg5[%c0_6, %c0_7], %9 {strides = array<i32>} : memref<8x128xf32, #tpu.memory_space<vmem>>, vector<8x128xf32>,
    %c0_8 = arith.constant 0 : index
    %c0_9 = arith.constant 0 : index
    %11 = vector.load %arg6[%c0_8, %c0_9] : memref<8x128xf32, #tpu.memory_space<vmem>>, vector<8x128xf32>
    %12 = vector.shape_cast %3 : vector<16x128xf32> to vector<2x8x128xf32>
    %cst_10 = arith.constant dense<0.000000e+00> : vector<8x128xf32>
    %13 = vector.multi_reduction <add>, %12, %cst_10 [0] : vector<2x8x128xf32> to vector<8x128xf32>
    %14 = arith.addf %11, %13 : vector<8x128xf32>
    %c0_11 = arith.constant 0 : index
    %c0_12 = arith.constant 0 : index
    %15 = vector.load %arg6[%c0_11, %c0_12] : memref<8x128xf32, #tpu.memory_space<vmem>>, vector<8x128xf32>
    tpu.vector_store %arg6[%c0_11, %c0_12], %14 {strides = array<i32>} : memref<8x128xf32, #tpu.memory_space<vmem>>, vector<8x128xf32>,
    %c0_13 = arith.constant 0 : index
    %c0_14 = arith.constant 0 : index
    %16 = vector.load %arg7[%c0_13, %c0_14] : memref<8x128xf32, #tpu.memory_space<vmem>>, vector<8x128xf32>
    %17 = vector.shape_cast %4 : vector<16x128xf32> to vector<2x8x128xf32>
    %cst_15 = arith.constant dense<0.000000e+00> : vector<8x128xf32>
    %18 = vector.multi_reduction <add>, %17, %cst_15 [0] : vector<2x8x128xf32> to vector<8x128xf32>
    %19 = arith.addf %16, %18 : vector<8x128xf32>
    %c0_16 = arith.constant 0 : index
    %c0_17 = arith.constant 0 : index
    %20 = vector.load %arg7[%c0_16, %c0_17] : memref<8x128xf32, #tpu.memory_space<vmem>>, vector<8x128xf32>
    tpu.vector_store %arg7[%c0_16, %c0_17], %19 {strides = array<i32>} : memref<8x128xf32, #tpu.memory_space<vmem>>, vector<8x128xf32>,
    %c0_i32_18 = arith.constant 0 : i32
    %21 = arith.cmpi eq, %arg1, %c0_i32_18 : i32
    %22 = arith.extui %21 : i1 to i32
    %c0_i32_19 = arith.constant 0 : i32
    %23 = arith.cmpi ne, %22, %c0_i32_19 : i32
    scf.if %23 {
      %c0_20 = arith.constant 0 : index
      %c0_21 = arith.constant 0 : index
      %24 = vector.load %arg5[%c0_20, %c0_21] : memref<8x128xf32, #tpu.memory_space<vmem>>, vector<8x128xf32>
      %cst_22 = arith.constant dense<0.000000e+00> : vector<128xf32>
      %25 = vector.multi_reduction <add>, %24, %cst_22 [0] : vector<8x128xf32> to vector<128xf32>
      %26 = vector.shape_cast %25 : vector<128xf32> to vector<1x128xf32>
      %c0_23 = arith.constant 0 : index
      %c0_24 = arith.constant 0 : index
      %c0_25 = arith.constant 0 : index
      %27 = vector.load %arg4[%c0_23, %c0_24, %c0_25] : memref<1x3x128xf32, #tpu.memory_space<vmem>>, vector<1x1x128xf32>
      %28 = vector.shape_cast %27 : vector<1x1x128xf32> to vector<1x128xf32>
      %29 = vector.shape_cast %26 : vector<1x128xf32> to vector<1x1x128xf32>
      tpu.vector_store %arg4[%c0_23, %c0_24, %c0_25], %29 {strides = array<i32>} : memref<1x3x128xf32, #tpu.memory_space<vmem>>, vector<1x1x128xf32>,
      %c0_26 = arith.constant 0 : index
      %c0_27 = arith.constant 0 : index
      %30 = vector.load %arg6[%c0_26, %c0_27] : memref<8x128xf32, #tpu.memory_space<vmem>>, vector<8x128xf32>
      %cst_28 = arith.constant dense<0.000000e+00> : vector<128xf32>
      %31 = vector.multi_reduction <add>, %30, %cst_28 [0] : vector<8x128xf32> to vector<128xf32>
      %32 = vector.shape_cast %31 : vector<128xf32> to vector<1x128xf32>
      %c0_29 = arith.constant 0 : index
      %c1 = arith.constant 1 : index
      %c0_30 = arith.constant 0 : index
      %33 = vector.load %arg4[%c0_29, %c1, %c0_30] : memref<1x3x128xf32, #tpu.memory_space<vmem>>, vector<1x1x128xf32>
      %34 = vector.shape_cast %33 : vector<1x1x128xf32> to vector<1x128xf32>
      %35 = vector.shape_cast %32 : vector<1x128xf32> to vector<1x1x128xf32>
      tpu.vector_store %arg4[%c0_29, %c1, %c0_30], %35 {strides = array<i32>} : memref<1x3x128xf32, #tpu.memory_space<vmem>>, vector<1x1x128xf32>,
      %c0_31 = arith.constant 0 : index
      %c0_32 = arith.constant 0 : index
      %36 = vector.load %arg7[%c0_31, %c0_32] : memref<8x128xf32, #tpu.memory_space<vmem>>, vector<8x128xf32>
      %cst_33 = arith.constant dense<0.000000e+00> : vector<128xf32>
      %37 = vector.multi_reduction <add>, %36, %cst_33 [0] : vector<8x128xf32> to vector<128xf32>
      %38 = vector.shape_cast %37 : vector<128xf32> to vector<1x128xf32>
      %c0_34 = arith.constant 0 : index
      %c2 = arith.constant 2 : index
      %c0_35 = arith.constant 0 : index
      %39 = vector.load %arg4[%c0_34, %c2, %c0_35] : memref<1x3x128xf32, #tpu.memory_space<vmem>>, vector<1x1x128xf32>
      %40 = vector.shape_cast %39 : vector<1x1x128xf32> to vector<1x128xf32>
      %41 = vector.shape_cast %38 : vector<1x128xf32> to vector<1x1x128xf32>
      tpu.vector_store %arg4[%c0_34, %c2, %c0_35], %41 {strides = array<i32>} : memref<1x3x128xf32, #tpu.memory_space<vmem>>, vector<1x1x128xf32>,
    } else {
    }
    return
  }
  func.func @transform_0(%arg0: i32, %arg1: i32) -> (i32, i32) {
    %c1_i32 = arith.constant 1 : i32
    %0 = arith.muli %arg0, %c1_i32 : i32
    %1 = arith.addi %0, %arg1 : i32
    %c0_i32 = arith.constant 0 : i32
    %c0_i32_0 = arith.constant 0 : i32
    return %1, %c0_i32 : i32, i32
  }
  func.func @transform_1(%arg0: i32, %arg1: i32) -> (i32, i32) {
    %c1_i32 = arith.constant 1 : i32
    %0 = arith.muli %arg0, %c1_i32 : i32
    %1 = arith.addi %0, %arg1 : i32
    %c0_i32 = arith.constant 0 : i32
    %c0_i32_0 = arith.constant 0 : i32
    return %1, %c0_i32 : i32, i32
  }
  func.func @transform_2(%arg0: i32, %arg1: i32) -> (i32, i32, i32) {
    %c0_i32 = arith.constant 0 : i32
    %c0_i32_0 = arith.constant 0 : i32
    %c0_i32_1 = arith.constant 0 : i32
    return %arg0, %c0_i32, %c0_i32_0 : i32, i32, i32
  }
}

</mosaic_0001>

<bundles_post_ra>
// kernel: tpu_custom_call.1
= control target key start
LH: loop header
LB: loop body
LE: loop exit
PB: predicated region body
PF: predicated region fallthrough
CT: control target
= control target key end

     0   :  { %7 = vsyncpa [#allocation6], 0  ;;  %s191_s0 = inlined_call_operand.hbm [shape: f32[16,128], index: 0, kind: input, shape index: {}]   ;;  %s192_s1 = inlined_call_operand.hbm [shape: f32[16,128], index: 1, kind: input, shape index: {}]   ;;  %s193_s2 = inlined_call_operand.vmem [shape: f32[1,3,128], index: 2, kind: output, shape index: {}]  }
   0x1   :  { %8 = vsyncpa [#allocation8], 0  ;;  %s157_s9 = smov [#allocation5]  }
   0x2   :  { %s18_s10 = sshll.u32 %s157_s9, 4  ;;  %s19_s10 = int_to_ptr.vmem [resolvable:$true] %s18_s10 }
   0x3   :  { %s121_s11 = scalar_lea.vmem %s19_s10, 256  ;;  %p126_p1 = scmp.lt.s32.totalorder %s19_s10, %s19_s10 }
   0x4   :  { %p122_p0 = scmp.ne.s32.totalorder %s19_s10, %s121_s11  ;;  %p127_p2 = scmp.lt.s32.totalorder %s121_s11, %s121_s11 }
   0x6   :  { %p128_p3 = por %p127_p2, %p126_p1 }
   0x8   :  { %p129_p4 = pnand %p128_p3, %p122_p0 }
   0xa   :  { %132 = shalt.err (!%p129_p4)
}
   0xb   :  { %s158_s12 = smov 128   ;;  %s159_s13 = smov 8  }
   0xc   :  { %24 = dma.hbm_to_vmem [thread:$0]  %s191_s0, 256, %s19_s10, [#allocation6], %s158_s12, %s158_s12, %s159_s13  }
   0xd   :  { %s160_s16 = smov [#allocation7]  }
   0xe   :  { %s34_s17 = sshll.u32 %s160_s16, 4  ;;  %s35_s17 = int_to_ptr.vmem [resolvable:$true] %s34_s17 }
   0xf   :  { %s141_s18 = scalar_lea.vmem %s35_s17, 256  ;;  %p146_p6 = scmp.lt.s32.totalorder %s35_s17, %s35_s17 }
  0x10   :  { %p142_p5 = scmp.ne.s32.totalorder %s35_s17, %s141_s18  ;;  %p147_p7 = scmp.lt.s32.totalorder %s141_s18, %s141_s18 }
  0x12   :  { %p148_p8 = por %p147_p7, %p146_p6 }
  0x14   :  { %p149_p9 = pnand %p148_p8, %p142_p5 }
  0x16   :  { %152 = shalt.err (!%p149_p9)
}
  0x17   :  { %40 = dma.hbm_to_vmem [thread:$0]  %s192_s1, 256, %s35_s17, [#allocation8], %s158_s12, %s158_s12, %s159_s13  }
  0x18   :  { %153 = dma.done.wait [#allocation6], 256  }
  0x19   :  { %154 = vsyncadd [#allocation6], 4294967040 }
  0x1a   :  { %155 = dma.done.wait [#allocation8], 256  }
  0x1b   :  { %156 = vsyncadd [#allocation8], 4294967040  ;;  %v58_v0 = vld [vmem:[#allocation5] sm:$0xff]  ;;  %v59_v1 = vld [vmem:[#allocation5 + $0x8] sm:$0xff] }
  0x1c   :  { %v60_v2 = vld [vmem:[#allocation7] sm:$0xff]  ;;  %v61_v3 = vld [vmem:[#allocation7 + $0x8] sm:$0xff]  ;;  %v69_v5 = vadd.f32 %v59_v1, %v58_v0 }
  0x1d   :  { %v63_v4 = vmul.f32 %v60_v2, %v58_v0  ;;  %v64_v6 = vmul.f32 %v61_v3, %v59_v1  ;;  %v73_v7 = vadd.f32 %v61_v3, %v60_v2 }
  0x1e   :  { %v88_v8 = vrot.slane %v69_v5, 4 }
  0x1f   :  { %v65_v9 = vadd.f32 %v64_v6, %v63_v4  ;;  %v96_v10 = vrot.slane %v73_v7, 4 }
  0x20   :  { %v89_v11 = vadd.f32 %v88_v8, %v69_v5 }
  0x21   :  { %v80_v12 = vrot.slane %v65_v9, 4  ;;  %v97_v13 = vadd.f32 %v96_v10, %v73_v7 }
  0x22   :  { %v90_v14 = vrot.slane %v89_v11, 2 }
  0x23   :  { %v81_v15 = vadd.f32 %v80_v12, %v65_v9  ;;  %v98_v16 = vrot.slane %v97_v13, 2 }
  0x24   :  { %v91_v17 = vadd.f32 %v90_v14, %v89_v11 }
  0x25   :  { %v82_v18 = vrot.slane %v81_v15, 2  ;;  %v99_v19 = vadd.f32 %v98_v16, %v97_v13 }
  0x26   :  { %v92_v20 = vrot.slane %v91_v17, 1 }
  0x27   :  { %v83_v21 = vadd.f32 %v82_v18, %v81_v15  ;;  %v100_v22 = vrot.slane %v99_v19, 1 }
  0x28   :  { %v93_v23 = vadd.f32 %v92_v20, %v91_v17 }
  0x29   :  { %v84_v24 = vrot.slane %v83_v21, 1  ;;  %v101_v25 = vadd.f32 %v100_v22, %v99_v19 }
  0x2a   :  { %94 = vst [vmem:[%s193_s2 + $0x1] sm:$0x1] %v93_v23 }
  0x2b   :  { %v85_v26 = vadd.f32 %v84_v24, %v83_v21  ;;  %102 = vst [vmem:[%s193_s2 + $0x2] sm:$0x1] %v101_v25 }
  0x2d   :  { %86 = vst [vmem:[%s193_s2] sm:$0x1] %v85_v26 }
  0x2e   :  { %107 = vsyncpa [#allocation6], 1 }
  0x2f   :  { %108 = vsyncpa [#allocation8], 1 }

</bundles_post_ra>
